<compile_context>
chip_gen: v7x
topology: tpu7x:2x2x1
jax: 0.10.0
libtpu: 0.0.40
codegen_flags: <defaults>
</compile_context>

<pallas_src>
import functools

import numpy as np
import jax
import jax.numpy as jnp
from jax import lax
from jax.experimental import pallas as pl
from jax.experimental.pallas import tpu as pltpu


# ---------------------------------------------------------------------------
# Glue: bicubic interpolation matrices (data-independent, plain numpy)
# torch bicubic, a = -0.75, align_corners=False, no antialiasing.
# ---------------------------------------------------------------------------
def _cubic_weights(s, a=-0.75):
    s = np.abs(s)
    return np.where(
        s <= 1.0,
        (a + 2.0) * s**3 - (a + 3.0) * s**2 + 1.0,
        np.where(s < 2.0, a * s**3 - 5.0 * a * s**2 + 8.0 * a * s - 4.0 * a, 0.0),
    )


def _bicubic_matrix(out_size, in_size):
    """R[j, i] such that resized[j] = sum_i R[j, i] * src[i]."""
    R = np.zeros((out_size, in_size), dtype=np.float32)
    scale = in_size / out_size
    for j in range(out_size):
        x = (j + 0.5) * scale - 0.5
        x0 = int(np.floor(x))
        t = x - x0
        idxs = [x0 - 1, x0, x0 + 1, x0 + 2]
        ws = _cubic_weights(np.array([t + 1.0, t, 1.0 - t, 2.0 - t]))
        for idx, w in zip(idxs, ws):
            idx = min(max(idx, 0), in_size - 1)  # replicate-pad at edges
            R[j, idx] += w
    return R


def _resize_dims(H, W, size_):
    # torchvision Resize(int): shorter edge -> size_, preserve aspect ratio
    if H <= W:
        return size_, int(size_ * W / H)
    return int(size_ * H / W), size_


# ---------------------------------------------------------------------------
# Pallas kernel: fused multi-scale separable bicubic resize (+ folded center crop)
# ---------------------------------------------------------------------------
def _make_tta_kernel(B, H, W, size, S):
    def kernel(rh_ref, rwt_ref, img_ref, *rest):
        # rh_ref  : (S*size, H)   bf16  stacked cropped row-interp matrices
        # rwt_ref : (S, W, size)  bf16  per-scale cropped col-interp matrices (transposed)
        # img_ref : (B, H, W)     input planes
        # rest    : S output refs (B, size, size) + 1 VMEM scratch (B, S*size, W) bf16
        out_refs = rest[:S]
        u_scratch = rest[S]
        rh = rh_ref[...]  # (S*size, H) bf16, kept live across the plane loop (small)

        # ---- Height pass: one (S*size, H) @ (H, W) matmul per plane (large M). ----
        # fori_loop bounds the per-plane f32 temporaries' live ranges.
        def height_pass(b, carry):
            img_b = img_ref[b].astype(jnp.bfloat16)                      # (H, W)
            u = jnp.dot(rh, img_b, preferred_element_type=jnp.float32)   # (S*size, W)
            u_scratch[b] = u.astype(jnp.bfloat16)
            return carry

        lax.fori_loop(0, B, height_pass, 0)

        # ---- Width pass: per scale, ONE (B*size, W) @ (W, size) matmul. ----
        # Result is already (B, size, size): full-block store, no concatenate/transpose.
        for s in range(S):                                               # static, S is small
            lhs = u_scratch[:, s * size:(s + 1) * size, :]               # (B, size, W) bf16
            res = jnp.dot(lhs.reshape(B * size, W), rwt_ref[s],
                          preferred_element_type=jnp.float32)            # (B*size, size)
            out_refs[s][...] = res.reshape(B, size, size).astype(out_refs[s].dtype)

    return kernel


def _vmem_budgets():
    """(data budget, scoped vmem limit) per TPU generation."""
    cap = 64 * 1024 * 1024  # conservative default (v7x-sized) if query fails
    try:
        info = pltpu.get_tpu_info()
        for attr in ("vmem_capacity_bytes", "vmem_bytes", "vmem_size_bytes"):
            v = getattr(info, attr, None)
            if v:
                cap = int(v)
                break
    except Exception:
        pass
    if cap >= 96 * 1024 * 1024:                 # 128 MiB parts (v5e / v6e): big tiles
        return 48 * 1024 * 1024, 96 * 1024 * 1024
    return 22 * 1024 * 1024, 48 * 1024 * 1024   # 64 MiB parts (v7x) / unknown: stay tight


def _pick_plane_batch(NC, H, W, size, S, itemsize, data_budget):
    """Planes per grid step, sized purely against the VMEM data budget (no divisor games)."""
    per_plane = (
        2 * H * W * itemsize              # image block, double-buffered
        + 2 * S * size * size * itemsize  # S output blocks, double-buffered
        + S * size * W * 2                # u_scratch rows (bf16)
        + size * (W * 2 + size * 4)       # per-plane share of width-pass temporaries
    )
    fixed = (
        2 * 2 * (S * size * H + S * W * size)  # rh + rwt (bf16, double-buffered)
        + H * W * 2                            # one plane's bf16 copy (height pass)
        + S * size * W * 4                     # one plane's f32 height-pass result
    )
    avail = max(data_budget - fixed, per_plane)
    B = max(1, min(NC, avail // per_plane))
    if NC >= 2:
        B = min(B, pl.cdiv(NC, 2))  # keep >= 2 grid steps: pipelining + v7x dual-TC split
    return int(B)


@functools.lru_cache(maxsize=None)
def _build_tta_call(NC, H, W, size, S, dtype_name):
    dtype = np.dtype(dtype_name)
    data_budget, vmem_limit = _vmem_budgets()
    B = _pick_plane_batch(NC, H, W, size, S, dtype.itemsize, data_budget)
    grid = (pl.cdiv(NC, B),)

    flops = 2 * NC * S * size * W * (H + size)
    bytes_accessed = int(NC * (H * W + S * size * size) * dtype.itemsize
                         + (S * size * H + S * W * size) * 2)

    out_shapes = tuple(jax.ShapeDtypeStruct((NC, size, size), dtype) for _ in range(S))
    out_specs = tuple(pl.BlockSpec((B, size, size), lambda i: (i, 0, 0)) for _ in range(S))

    # TODO(synk): if input DMA is still exposed after enlarging B, try
    # pipeline_mode=pl.Buffered(3) on the image BlockSpec (check v7x 64 MiB headroom first).
    return pl.pallas_call(
        _make_tta_kernel(B, H, W, size, S),
        out_shape=out_shapes,
        grid_spec=pltpu.PrefetchScalarGridSpec(
            num_scalar_prefetch=0,
            grid=grid,
            in_specs=[
                pl.BlockSpec((S * size, H), lambda i: (0, 0)),      # Rh (all scales, stacked rows)
                pl.BlockSpec((S, W, size), lambda i: (0, 0, 0)),    # Rw^T per scale
                pl.BlockSpec((B, H, W), lambda i: (i, 0, 0)),       # B image planes
            ],
            out_specs=out_specs,
            scratch_shapes=[pltpu.VMEM((B, S * size, W), jnp.bfloat16)],
        ),
        compiler_params=pltpu.CompilerParams(
            dimension_semantics=("parallel",),
            vmem_limit_bytes=vmem_limit,
        ),
        cost_estimate=pl.CostEstimate(
            flops=flops, transcendentals=0, bytes_accessed=bytes_accessed),
    )


# ---------------------------------------------------------------------------
# TTA module equivalent
# ---------------------------------------------------------------------------
class TTA:
    def __init__(self, size, scales=(1.0, 1.05, 1.1)):
        self.size = size
        self.scales = list(scales)
        self._matrix_cache = {}   # (H, W) -> (rh_all bf16 (S*size,H), rwt_all bf16 (S,W,size))

    def _interp_matrices(self, H, W):
        key = (H, W)
        if key in self._matrix_cache:
            return self._matrix_cache[key]
        rh_blocks, rwt_blocks = [], []
        for scale in self.scales:
            size_ = int(scale * self.size)          # matches reference: int() truncation
            new_h, new_w = _resize_dims(H, W, size_)
            rh = _bicubic_matrix(new_h, H)
            rw = _bicubic_matrix(new_w, W)
            # CenterCrop(size) folded into the interpolation matrices (free inside the kernel)
            top = int(round((new_h - self.size) / 2.0))
            left = int(round((new_w - self.size) / 2.0))
            # TODO(synk): CenterCrop pad path (resized image smaller than the crop) not implemented
            assert top >= 0 and left >= 0
            rh_blocks.append(rh[top:top + self.size, :])        # (size, H)
            rwt_blocks.append(rw[left:left + self.size, :].T)   # (W, size)
        rh_all = jnp.asarray(np.concatenate(rh_blocks, axis=0), dtype=jnp.bfloat16)   # (S*size, H)
        rwt_all = jnp.asarray(np.stack(rwt_blocks, axis=0), dtype=jnp.bfloat16)       # (S, W, size)
        self._matrix_cache[key] = (rh_all, rwt_all)
        return rh_all, rwt_all

    def __call__(self, img):
        # img: (N, C, H, W) float  (NCHW, like PyTorch)
        N, C, H, W = img.shape
        S = len(self.scales)
        rh_all, rwt_all = self._interp_matrices(H, W)
        img_flat = img.reshape(N * C, H, W)
        call = _build_tta_call(N * C, H, W, self.size, S, np.dtype(img.dtype).name)
        outs = call(rh_all, rwt_all, img_flat)     # tuple of S arrays (NC, size, size)
        return [o.reshape(N, C, self.size, self.size) for o in outs]

    def __repr__(self):
        return f"{self.__class__.__name__}(size={self.size}, scale={self.scales})"


if __name__ == "__main__":
    key = jax.random.PRNGKey(0)
    N, C, H, W = 2, 3, 20, 20
    img = jax.random.uniform(key, (N, C, H, W), dtype=jnp.float32)

    tta = TTA(size=16, scales=[1.0, 1.05, 1.1])
    outs = tta(img)
    for o in outs:
        jax.block_until_ready(o)
        assert o.shape == (N, C, 16, 16)

    # Correctness sanity check vs. a pure-numpy separable bicubic reference (f64 matrices).
    img_np = np.asarray(img, dtype=np.float64)
    for scale, o in zip(tta.scales, outs):
        size_ = int(scale * tta.size)
        new_h, new_w = _resize_dims(H, W, size_)
        rh = _bicubic_matrix(new_h, H)
        rw = _bicubic_matrix(new_w, W)
        top = int(round((new_h - tta.size) / 2.0))
        left = int(round((new_w - tta.size) / 2.0))
        rh_c = rh[top:top + tta.size].astype(np.float64)
        rw_c = rw[left:left + tta.size].astype(np.float64)
        ref = np.einsum('ih,nchw,jw->ncij', rh_c, img_np, rw_c)
        np.testing.assert_allclose(np.asarray(o, dtype=np.float64), ref, atol=0.08, rtol=0)

    print("KERNEL_OK")
</pallas_src>

<mosaic_0001>
module attributes {stable_mosaic.version = 11 : i64} {
  func.func @kernel(%arg0: i32, %arg1: memref<48x20xbf16, #tpu.memory_space<vmem>>, %arg2: memref<3x20x16xbf16, #tpu.memory_space<vmem>>, %arg3: memref<3x20x20xf32, #tpu.memory_space<vmem>>, %arg4: memref<3x16x16xf32, #tpu.memory_space<vmem>>, %arg5: memref<3x16x16xf32, #tpu.memory_space<vmem>>, %arg6: memref<3x16x16xf32, #tpu.memory_space<vmem>>, %arg7: memref<3x48x20xbf16, #tpu.memory_space<vmem>>) attributes {dimension_semantics = [#tpu.dimension_semantics<parallel>], iteration_bounds = array<i64: 2>, scalar_prefetch = 0 : i64, scratch_operands = 1 : i64, tpu.core_type = #tpu.core_type<tc>, window_params = [{pipeline_mode = #tpu.pipeline_mode<synchronous>, transform_indices = @transform_0, window_bounds = array<i64: 48, 20>}, {pipeline_mode = #tpu.pipeline_mode<synchronous>, transform_indices = @transform_1, window_bounds = array<i64: 3, 20, 16>}, {transform_indices = @transform_2, window_bounds = array<i64: 3, 20, 20>}, {transform_indices = @transform_3, window_bounds = array<i64: 3, 16, 16>}, {transform_indices = @transform_4, window_bounds = array<i64: 3, 16, 16>}, {transform_indices = @transform_5, window_bounds = array<i64: 3, 16, 16>}]} {
    %c0 = arith.constant 0 : index
    %c0_0 = arith.constant 0 : index
    %0 = vector.load %arg1[%c0, %c0_0] : memref<48x20xbf16, #tpu.memory_space<vmem>>, vector<48x20xbf16>
    %c0_i32 = arith.constant 0 : i32
    %c3_i32 = arith.constant 3 : i32
    %1 = arith.addi %c0_i32, %c3_i32 : i32
    %c1_i32 = arith.constant 1 : i32
    scf.for %arg8 = %c0_i32 to %1 step %c1_i32  : i32 {
      %23 = arith.index_cast %arg8 : i32 to index
      %c0_27 = arith.constant 0 : index
      %c0_28 = arith.constant 0 : index
      %24 = vector.load %arg3[%23, %c0_27, %c0_28] : memref<3x20x20xf32, #tpu.memory_space<vmem>>, vector<1x20x20xf32>
      %25 = vector.shape_cast %24 : vector<1x20x20xf32> to vector<20x20xf32>
      %26 = arith.truncf %25 : vector<20x20xf32> to vector<20x20xbf16>
      %cst_29 = arith.constant dense<0.000000e+00> : vector<48x20xf32>
      %27 = tpu.matmul %0, %26, %cst_29 {dimension_numbers = #tpu.dot_dimension_numbers<[1], [0], [0], [1], [0, 0, 1, 1], [], []>} : vector<48x20xbf16>, vector<20x20xbf16>, vector<48x20xf32> -> vector<48x20xf32>
      %28 = arith.truncf %27 : vector<48x20xf32> to vector<48x20xbf16>
      %29 = arith.index_cast %arg8 : i32 to index
      %c0_30 = arith.constant 0 : index
      %c0_31 = arith.constant 0 : index
      %30 = vector.load %arg7[%29, %c0_30, %c0_31] : memref<3x48x20xbf16, #tpu.memory_space<vmem>>, vector<1x48x20xbf16>
      %31 = vector.shape_cast %30 : vector<1x48x20xbf16> to vector<48x20xbf16>
      %32 = vector.shape_cast %28 : vector<48x20xbf16> to vector<1x48x20xbf16>
      tpu.vector_store %arg7[%29, %c0_30, %c0_31], %32 {strides = array<i32>} : memref<3x48x20xbf16, #tpu.memory_space<vmem>>, vector<1x48x20xbf16>,
    }
    %c3_i32_1 = arith.constant 3 : i32
    %c0_2 = arith.constant 0 : index
    %c0_3 = arith.constant 0 : index
    %c0_4 = arith.constant 0 : index
    %2 = vector.load %arg7[%c0_2, %c0_3, %c0_4] : memref<3x48x20xbf16, #tpu.memory_space<vmem>>, vector<3x16x20xbf16>
    %3 = vector.shape_cast %2 : vector<3x16x20xbf16> to vector<48x20xbf16>
    %c0_5 = arith.constant 0 : index
    %c0_6 = arith.constant 0 : index
    %c0_7 = arith.constant 0 : index
    %4 = vector.load %arg2[%c0_5, %c0_6, %c0_7] : memref<3x20x16xbf16, #tpu.memory_space<vmem>>, vector<1x20x16xbf16>
    %5 = vector.shape_cast %4 : vector<1x20x16xbf16> to vector<20x16xbf16>
    %cst = arith.constant dense<0.000000e+00> : vector<48x16xf32>
    %6 = tpu.matmul %3, %5, %cst {dimension_numbers = #tpu.dot_dimension_numbers<[1], [0], [0], [1], [0, 0, 1, 1], [], []>} : vector<48x20xbf16>, vector<20x16xbf16>, vector<48x16xf32> -> vector<48x16xf32>
    %7 = vector.shape_cast %6 : vector<48x16xf32> to vector<3x16x16xf32>
    %c0_8 = arith.constant 0 : index
    %c0_9 = arith.constant 0 : index
    %c0_10 = arith.constant 0 : index
    %8 = vector.load %arg4[%c0_8, %c0_9, %c0_10] : memref<3x16x16xf32, #tpu.memory_space<vmem>>, vector<3x16x16xf32>
    tpu.vector_store %arg4[%c0_8, %c0_9, %c0_10], %7 {strides = array<i32>} : memref<3x16x16xf32, #tpu.memory_space<vmem>>, vector<3x16x16xf32>,
    %c0_11 = arith.constant 0 : index
    %c16 = arith.constant 16 : index
    %c0_12 = arith.constant 0 : index
    %9 = vector.load %arg7[%c0_11, %c16, %c0_12] : memref<3x48x20xbf16, #tpu.memory_space<vmem>>, vector<3x16x20xbf16>
    %10 = vector.shape_cast %9 : vector<3x16x20xbf16> to vector<48x20xbf16>
    %c1 = arith.constant 1 : index
    %c0_13 = arith.constant 0 : index
    %c0_14 = arith.constant 0 : index
    %11 = vector.load %arg2[%c1, %c0_13, %c0_14] : memref<3x20x16xbf16, #tpu.memory_space<vmem>>, vector<1x20x16xbf16>
    %12 = vector.shape_cast %11 : vector<1x20x16xbf16> to vector<20x16xbf16>
    %cst_15 = arith.constant dense<0.000000e+00> : vector<48x16xf32>
    %13 = tpu.matmul %10, %12, %cst_15 {dimension_numbers = #tpu.dot_dimension_numbers<[1], [0], [0], [1], [0, 0, 1, 1], [], []>} : vector<48x20xbf16>, vector<20x16xbf16>, vector<48x16xf32> -> vector<48x16xf32>
    %14 = vector.shape_cast %13 : vector<48x16xf32> to vector<3x16x16xf32>
    %c0_16 = arith.constant 0 : index
    %c0_17 = arith.constant 0 : index
    %c0_18 = arith.constant 0 : index
    %15 = vector.load %arg5[%c0_16, %c0_17, %c0_18] : memref<3x16x16xf32, #tpu.memory_space<vmem>>, vector<3x16x16xf32>
    tpu.vector_store %arg5[%c0_16, %c0_17, %c0_18], %14 {strides = array<i32>} : memref<3x16x16xf32, #tpu.memory_space<vmem>>, vector<3x16x16xf32>,
    %c0_19 = arith.constant 0 : index
    %c32 = arith.constant 32 : index
    %c0_20 = arith.constant 0 : index
    %16 = vector.load %arg7[%c0_19, %c32, %c0_20] : memref<3x48x20xbf16, #tpu.memory_space<vmem>>, vector<3x16x20xbf16>
    %17 = vector.shape_cast %16 : vector<3x16x20xbf16> to vector<48x20xbf16>
    %c2 = arith.constant 2 : index
    %c0_21 = arith.constant 0 : index
    %c0_22 = arith.constant 0 : index
    %18 = vector.load %arg2[%c2, %c0_21, %c0_22] : memref<3x20x16xbf16, #tpu.memory_space<vmem>>, vector<1x20x16xbf16>
    %19 = vector.shape_cast %18 : vector<1x20x16xbf16> to vector<20x16xbf16>
    %cst_23 = arith.constant dense<0.000000e+00> : vector<48x16xf32>
    %20 = tpu.matmul %17, %19, %cst_23 {dimension_numbers = #tpu.dot_dimension_numbers<[1], [0], [0], [1], [0, 0, 1, 1], [], []>} : vector<48x20xbf16>, vector<20x16xbf16>, vector<48x16xf32> -> vector<48x16xf32>
    %21 = vector.shape_cast %20 : vector<48x16xf32> to vector<3x16x16xf32>
    %c0_24 = arith.constant 0 : index
    %c0_25 = arith.constant 0 : index
    %c0_26 = arith.constant 0 : index
    %22 = vector.load %arg6[%c0_24, %c0_25, %c0_26] : memref<3x16x16xf32, #tpu.memory_space<vmem>>, vector<3x16x16xf32>
    tpu.vector_store %arg6[%c0_24, %c0_25, %c0_26], %21 {strides = array<i32>} : memref<3x16x16xf32, #tpu.memory_space<vmem>>, vector<3x16x16xf32>,
    return
  }
  func.func @transform_0(%arg0: i32) -> (i32, i32) {
    %c0_i32 = arith.constant 0 : i32
    %c0_i32_0 = arith.constant 0 : i32
    %c0_i32_1 = arith.constant 0 : i32
    return %c0_i32, %c0_i32_0 : i32, i32
  }
  func.func @transform_1(%arg0: i32) -> (i32, i32, i32) {
    %c0_i32 = arith.constant 0 : i32
    %c0_i32_0 = arith.constant 0 : i32
    %c0_i32_1 = arith.constant 0 : i32
    %c0_i32_2 = arith.constant 0 : i32
    return %c0_i32, %c0_i32_0, %c0_i32_1 : i32, i32, i32
  }
  func.func @transform_2(%arg0: i32) -> (i32, i32, i32) {
    %c0_i32 = arith.constant 0 : i32
    %c0_i32_0 = arith.constant 0 : i32
    %c0_i32_1 = arith.constant 0 : i32
    return %arg0, %c0_i32, %c0_i32_0 : i32, i32, i32
  }
  func.func @transform_3(%arg0: i32) -> (i32, i32, i32) {
    %c0_i32 = arith.constant 0 : i32
    %c0_i32_0 = arith.constant 0 : i32
    %c0_i32_1 = arith.constant 0 : i32
    return %arg0, %c0_i32, %c0_i32_0 : i32, i32, i32
  }
  func.func @transform_4(%arg0: i32) -> (i32, i32, i32) {
    %c0_i32 = arith.constant 0 : i32
    %c0_i32_0 = arith.constant 0 : i32
    %c0_i32_1 = arith.constant 0 : i32
    return %arg0, %c0_i32, %c0_i32_0 : i32, i32, i32
  }
  func.func @transform_5(%arg0: i32) -> (i32, i32, i32) {
    %c0_i32 = arith.constant 0 : i32
    %c0_i32_0 = arith.constant 0 : i32
    %c0_i32_1 = arith.constant 0 : i32
    return %arg0, %c0_i32, %c0_i32_0 : i32, i32, i32
  }
}

</mosaic_0001>

<bundles_post_ra>
// kernel: tpu_custom_call.1
= control target key start
LH: loop header
LB: loop body
LE: loop exit
PB: predicated region body
PF: predicated region fallthrough
CT: control target
= control target key end

     0   :  { %11 = vsyncpa [#allocation4], 0  ;;  %s1664_s0 = inlined_call_operand.vmem [shape: bf16[48,20], index: 0, kind: input, shape index: {}]   ;;  %s1665_s1 = inlined_call_operand.vmem [shape: bf16[3,20,16], index: 1, kind: input, shape index: {}]   ;;  %s1666_s2 = inlined_call_operand.hbm [shape: f32[6,20,20], index: 2, kind: input, shape index: {}]   ;;  %s1667_s3 = inlined_call_operand.hbm [shape: f32[6,16,16], index: 3, kind: output, shape index: {0}]   ;;  %s1668_s4 = inlined_call_operand.hbm [shape: f32[6,16,16], index: 4, kind: output, shape index: {1}]   ;;  %s1669_s5 = inlined_call_operand.hbm [shape: f32[6,16,16], index: 5, kind: output, shape index: {2}]  }
   0x1   :  { %13 = vsyncpa [#allocation4 + $0x1], 0 }
   0x2   :  { %14 = vsyncpa [#allocation5], 0 }
   0x3   :  { %16 = vsyncpa [#allocation5 + $0x1], 0 }
   0x4   :  { %17 = vsyncpa [#allocation8], 0 }
   0x5   :  { %19 = vsyncpa [#allocation8 + $0x1], 0  ;;  %s1292_s18 = smov 0   ;;  %s1294_s19 = smov 0  }
   0x6   :  { %s1296_s20 = smov 0   ;;  %s1298_s21 = smov 0  }
   0x7 LB: > { %s1313_s22 = sadd.s32 4294967295, %s1244_s21   ;;  %s858_s23 = sadd.s32 4294967294, %s1244_s21   ;;  %s1244_s21 = sphi %s1298_s21, %s1682_s21   ;;  %s1240_s20 = sphi %s1296_s20, %s1681_s20   ;;  %s1236_s19 = sphi %s1294_s19, %s1680_s19   ;;  %s1232_s18 = sphi %s1292_s18, %s1679_s18  }
   0x8   : > { %s1317_s24 = sadd.s32 1, %s1244_s21   ;;  %s74_s25 = sadd.s32 1, %s1240_s20 }
   0x9   : > { %s71_s26 = ssub.s32 %s1244_s21, %s1317_s24  ;;  %p81_p0 = scmp.ne.s32.totalorder %s1240_s20, %s1236_s19 }
   0xa   : > { %p72_p1 = scmp.eq.s32.totalorder %s71_s26, 0  ;;  %p82_p2 = scmp.eq.s32.totalorder %s1244_s21, 0 }
   0xb   : > { %p87_p3 = scmp.ne.s32.totalorder %s1236_s19, %s1232_s18  ;;  %p88_p4 = scmp.eq.s32.totalorder %s1313_s22, 0 }
   0xc   : > { %s1329_s27 = scalar_select %p72_p1, %s1240_s20, %s74_s25  }
   0xd   : > { %p83_p5 = por %p82_p2, %p81_p0  ;;  %p1331_p6 = por %p88_p4, %p87_p3 }
   0xe   : > { %p111_p7 = scmp.eq.s32.totalorder %s1313_s22, 1  ;;  %p117_p8 = scmp.eq.s32.totalorder %s858_s23, 1 }
   0xf   : > { %p1027_p10 = scmp.lt.s32.totalorder %s1244_s21, 2  ;;  %s195_s6 = sand.u32 1, %s1240_s20  }
  0x10   : > { %p1340_p11 = por %p111_p7, %p81_p0  ;;  %p1344_p12 = por %p117_p8, %p87_p3 }
  0x11   : > { %s1001_s7 = smul.u32 72, %s195_s6  ;;  %p1350_p13 = pnand %p1027_p10, %p83_p5 }
  0x12   : > { %s1672_s29 = scalar_select %p1340_p11, 1, 0 }
  0x13   : > { %s1673_s30 = scalar_select %p1344_p12, 1, 0 }
  0x14   : > { %s1028_s8 = smul.u32 1152, %s1244_s21  ;;  %s199_s13 = scalar_lea.vmem [#allocation3], %s1001_s7 }
  0x15   : > { %s207_s14 = sshll.u32 %s199_s13, 4  ;;  %s1362_s15 = scalar_lea.sflag [#allocation4], %s195_s6  ;;  %s1359_s14 = int_to_ptr.vmem [resolvable:$true] %s207_s14 }
  0x16   : > { %s1357_s12 = scalar_lea.hbm %s1666_s2, %s1028_s8  ;;  %p1086_p2 = pneg %p1350_p13 }
  0x17   : > { %s1084_s16 = scalar_lea.hbm %s1357_s12, 1152  ;;  %s1089_s26 = scalar_lea.hbm %s1666_s2, 2304 }
  0x18   : > { %p1085_p1 = scmp.ne.s32.totalorder %s1357_s12, %s1084_s16  ;;  %p1090_p5 = scmp.lt.u32.totalorder %s1357_s12, %s1666_s2 }
  0x19   : > { %p1091_p7 = scmp.lt.u32.totalorder %s1089_s26, %s1084_s16  ;;  %p1093_p10 = scmp.lt.u32.totalorder %s1084_s16, %s1357_s12 }
  0x1a   : > { %p1087_p3 = pnand %p1086_p2, %p1085_p1 }
  0x1b   : > { %p1092_p8 = por %p1091_p7, %p1090_p5 }
  0x1c   : > { %p1088_p4 = pneg %p1087_p3 }
  0x1d   : > { %p1094_p9 = por %p1093_p10, %p1092_p8 }
  0x1f   : > { %p1095_p0 = pnand %p1094_p9, %p1088_p4 }
  0x21   : > { %1098 = shalt.err (!%p1095_p0)
}
  0x22   : > { %s1099_s6 = scalar_lea.vmem %s1359_s14, 1152  ;;  %s1250_s10 = smov [#allocation3]  }
  0x23   : > { %p1100_p1 = scmp.ne.s32.totalorder %s1359_s14, %s1099_s6  ;;  %s1104_s11 = sshll.u32 %s1250_s10, 4  ;;  %s1105_s11 = int_to_ptr.vmem [resolvable:$false] %s1104_s11 }
  0x24   : > { %s1106_s13 = scalar_lea.vmem %s1105_s11, 2304  ;;  %p1107_p11 = scmp.lt.s32.totalorder %s1359_s14, %s1105_s11 }
  0x25   : > { %p1102_p3 = pnand %p1100_p1, %p1086_p2  ;;  %p1108_p5 = scmp.lt.s32.totalorder %s1106_s13, %s1099_s6 }
  0x27   : > { %p1103_p12 = pneg %p1102_p3  ;;  %p1109_p7 = por %p1108_p5, %p1107_p11 }
  0x29   : > { %p1110_p8 = pnand %p1109_p7, %p1103_p12 }
  0x2b   : > { %1113 = shalt.err (!%p1110_p8)
}
  0x2c   : > { %s1251_s16 = smov 128   ;;  %s1252_s17 = smov 8  }
  0x2d   : > { %1016 = dma.hbm_to_vmem [thread:$0]  (!%p1350_p13), %s1357_s12, 1152, %s1359_s14, %s1362_s15, %s1251_s16, %s1251_s16, %s1252_s17  }
  0x2e   : > { %p215_p9 = scmp.lt.s32.totalorder %s1244_s21, 3  ;;  %p1675_p0 = scmp.ge.s32.totalorder %s1244_s21, 1 }
  0x30   : > { %p216_p2 = pnand %p1675_p0, %p215_p9 }
  0x31   : > { %s1394_s25 = sand.u32 (!%p216_p2), 1, %s1236_s19  }
  0x32   : > { %219 = sbr.rel (%p216_p2) target bundleno = 592 (0x250), region = 32  ;;  %s222_s8 = scalar_lea.sflag (!%p216_p2), [#allocation4], %s1394_s25 }
  0x33   : > { %s1003_s26 = smul.u32 (!%p216_p2), 72, %s1394_s25 }
  0x35   : > { %s1398_s7 = scalar_lea.vmem (!%p216_p2), [#allocation3], %s1003_s26 }
  0x39   : > { %1219 = dma.done.wait (%p1331_p6), %s222_s8, 1152  }
  0x3a   : > { %1221 = vsyncadd (%p1331_p6), %s222_s8, 4294966144  ;;  %s1004_s9 = smul.u32 48, %s1394_s25  ;;  %v1408_v0 = vld [vmem:[%s1664_s0] sm:$0xf]  ;;  %v1413_v1 = vld [vmem:[%s1664_s0 + $0x4] sm:$0xf] }
  0x3b   : > { %v269_v2 = vld [vmem:[%s1664_s0 + $0x8] sm:$0xf]  ;;  %v270_v3 = vld [vmem:[%s1664_s0 + $0xc] sm:$0xf]  ;;  %v271_v4 = vld [vmem:[%s1664_s0 + $0x10] sm:$0xf] }
  0x3c   : > { %v272_v5 = vld [vmem:[%s1664_s0 + $0x14] sm:$0xf]  ;;  %s1427_s12 = scalar_lea.vmem [#allocation6], %s1004_s9  ;;  %s1429_s14 = scalar_lea.vmem [#allocation7], %s1004_s9 }
  0x3d   : > { %s1431_s15 = scalar_lea.vmem [#allocation9], %s1004_s9  ;;  %s1433_s6 = smov 0  }
  0x3e LB: >> { %v1253_v6 = vmov 0.0   ;;  %s279_s10 = smul.u32 24, %s1248_s6  ;;  %vm1254_vm0 = vmmov 0   ;;  %vm311_vm1 = vcmask 1041408   ;;  %v864_v13 = vcombine.low %v269_v2, %v270_v3  ;;  %s278_s6 = sadd.s32 1, %s1248_s6   ;;  %s1248_s6 = sphi %s1433_s6, %s278_s6  }
  0x3f   : >> { %993 = vmatprep.subr.bf16.mxu1 %v1253_v6  ;;  %929 = vmatprep.subr.bf16.mxu0 %v1253_v6  ;;  %v863_v14 = vcombine.low %v1408_v0, %v1413_v1  ;;  %vm301_vm2 = vcmask 162816   ;;  %v865_v15 = vcombine.low %v271_v4, %v272_v5  ;;  %p275_p6 = scmp.ge.s32.totalorder %s278_s6, 3  }
  0x40   : >> { %937 = vmatprep.mubr.msk.bf16.mxu1 %vm1254_vm0, %v1253_v6  ;;  %933 = vmatprep.mubr.msk.bf16.mxu0 %vm1254_vm0, %v1253_v6  ;;  %s280_s9 = scalar_lea.vmem %s1398_s7, %s279_s10 [#allocation3]  ;;  %s377_s11 = scalar_lea.vmem [#allocation2], %s279_s10  ;;  %v1078_v31 = vld [vmem:[%s1665_s1] sm:$0xff] (%p275_p6)   ;;  %v1255_v32 = vmov (%p275_p6), 0.0   ;;  %v1079_v33 = vld [vmem:[%s1665_s1 + $0x8] ss:$0 sps:$4 sm:$0x33] (%p275_p6)  }
  0x41   : >> { %v281_v7 = vld [vmem:[%s280_s9] sm:$0xff]  ;;  %v282_v8 = vld [vmem:[%s280_s9 + $0x8] sm:$0xff]  ;;  %v283_v9 = vld [vmem:[%s280_s9 + $0x10] sm:$0xf]  ;;  %vm1256_vm3 = vmmov (%p275_p6), 0   ;;  %v408_v34 = vsel (%p275_p6), %vm311_vm1, %v1079_v33, 0 }
  0x42   : >> { %v284_v10 = vpack.c.bf16 %v282_v8, %v281_v7  ;;  %v285_v11 = vpack.c.bf16 %v283_v9, %v283_v9  ;;  %v1080_v36 = vld [vmem:[%s1665_s1 + $0xc] sm:$0xff] (%p275_p6)   ;;  %v1082_v38 = vld [vmem:[%s1665_s1 + $0x14] ss:$0 sps:$4 sm:$0x33] (%p275_p6)   ;;  %v1081_v39 = vld [vmem:[%s1665_s1 + $0x18] sm:$0xff] (%p275_p6)   ;;  %vm467_vm4 = vcmask (%p275_p6), 130048  }
  0x43   : > { %v1083_v40 = vld [vmem:[%s1665_s1 + $0x20] ss:$0 sps:$4 sm:$0x33] (%p275_p6)   ;;  %v500_v41 = vsel (%p275_p6), %vm311_vm1, %v1082_v38, 0  ;;  %s1507_s16 = smul.u32 (%p275_p6), 768, %s1313_s22  ;;  %s681_s28 = sshll.u32 (%p275_p6), %s1427_s12, 4  ;;  %s1518_s28 = int_to_ptr.vmem [resolvable:$true] %s681_s28 }
  0x44   : >> { %995 = vmatpush3.bf16.msra.mxu1 %v284_v10  ;;  %930 = vmatpush3.bf16.msra.mxu0 %v284_v10  ;;  %v313_v12 = vsel %vm311_vm1, %v285_v11, 0  ;;  %v591_v42 = vsel (%p275_p6), %vm311_vm1, %v1083_v40, 0  ;;  %s657_s8 = scalar_lea.sflag (%p275_p6), [#allocation5], %s1394_s25  ;;  %s1114_s6 = scalar_lea.vmem (%p275_p6), %s1518_s28, 768 }
  0x45   : >> { %994 = vmatprep.subr.bf16.mxu1 %v1253_v6  ;;  %931 = vmatprep.subr.bf16.mxu0 %v1253_v6  ;;  %s1516_s26 = scalar_lea.hbm (%p275_p6), %s1667_s3, %s1507_s16  ;;  %p1115_p11 = scmp.ne.s32.totalorder (%p275_p6), %s1518_s28, %s1114_s6 }
  0x46   : > { %p1676_p12 = scmp.ne.s32.totalorder (%p275_p6), %s1672_s29, 0  ;;  %s1257_s10 = smov (%p275_p6), [#allocation6]  }
  0x47   : > { %s1118_s9 = sshll.u32 (%p275_p6), %s1257_s10, 4  ;;  %s1119_s9 = int_to_ptr.vmem [resolvable:$false] %s1118_s9 }
  0x48   : >> { %996 = vmatpush3.bf16.msra.mxu1 %v313_v12  ;;  %932 = vmatpush3.bf16.msra.mxu0 %v313_v12  ;;  %p1116_p13 = pnand (%p275_p6), %p1115_p11, %p1676_p12  ;;  %p1121_p10 = scmp.lt.s32.totalorder (%p275_p6), %s1518_s28, %s1119_s9 }
  0x49   : > { %997 = vmatprep.subr.bf16.mxu1 (%p275_p6), %v1255_v32  ;;  %945 = vmatprep.subr.bf16.mxu0 (%p275_p6), %v1255_v32 }
  0x4a   : > { %p1117_p4 = pneg (%p275_p6), %p1116_p13 }
  0x4b   : >> { %938 = vmatmul.mubr.msk.bf16.vlgmr.msra.gmra.mrb[0].mxu1 %vm301_vm2, %v864_v13  ;;  %934 = vmatmul.mubr.msk.bf16.vlgmr.msra.gmra.mrb[0].mxu0 %vm301_vm2, %v863_v14 }
  0x4c   : >> { %941 = vmatprep.mubr.msk.bf16.mxu1 %vm1254_vm0, %v1253_v6  ;;  %999 = vmatpush3.bf16.msra.mxu1 (%p275_p6), %v1078_v31 }
  0x4d   : > { %998 = vmatprep.subr.bf16.mxu1 (%p275_p6), %v1255_v32  ;;  %946 = vmatpush3.bf16.msra.mxu0 (%p275_p6), %v1078_v31 }
  0x4e   : > { %947 = vmatprep.subr.bf16.mxu0 (%p275_p6), %v1255_v32  ;;  %949 = vmatprep.mubr.msk.bf16.mxu0 (%p275_p6), %vm1256_vm3, %v1255_v32 }
  0x50   : > { %1000 = vmatpush3.bf16.msra.mxu1 (%p275_p6), %v408_v34 }
  0x51   : > { %961 = vmatprep.subr.bf16.mxu1 (%p275_p6), %v1255_v32  ;;  %948 = vmatpush3.bf16.msra.mxu0 (%p275_p6), %v408_v34 }
  0x52   : > { %977 = vmatprep.subr.bf16.mxu0 (%p275_p6), %v1255_v32 }
  0x53   : >> { %942 = vmatmul.mubr.msk.bf16.gmra.mrb[4].mxu1 %vm301_vm2, %v865_v15 }
  0x54   : > { %953 = vmatprep.mubr.msk.bf16.mxu1 (%p275_p6), %vm1256_vm3, %v1255_v32 }
 0x11e   : >> { %v357_v16 = vpop.f32.mrb[0].mxu1  ;;  %v349_v17 = vpop.f32.mrb[0].mxu0 }
 0x11f   : >> { %v939_v18 = vpop.f32.mrb[1].mxu1  ;;  %v935_v19 = vpop.f32.mrb[1].mxu0 }
 0x120   : >> { %v360_v20 = vpop.f32.mrb[2].mxu1  ;;  %v352_v21 = vpop.f32.mrb[2].mxu0 }
 0x121   : >> { %v373_v22 = vpack.c.bf16 %v360_v20, %v357_v16  ;;  %v940_v23 = vpop.f32.mrb[3].mxu1  ;;  %v372_v24 = vpack.c.bf16 %v352_v21, %v349_v17  ;;  %v936_v25 = vpop.f32.mrb[3].mxu0 }
 0x123   : >> { %379 = vst.msk [vmem:[%s377_s11 + $0x8] sm:$0xff] %vm301_vm2, %v373_v22  ;;  %378 = vst.msk [vmem:[%s377_s11] sm:$0xff] %vm301_vm2, %v372_v24 }
 0x125   : > { %277 = sbr.rel (!%p275_p6) target bundleno = 62 (0x3e), region = 120 }
 0x126   : >> { %v365_v26 = vpop.f32.mrb[4].mxu1 }
 0x127   : >> { %v943_v27 = vpop.f32.mrb[5].mxu1 }
 0x128   : >> { %v368_v28 = vpop.f32.mrb[6].mxu1 }
 0x129   : >> { %v374_v29 = vpack.c.bf16 %v368_v28, %v365_v26  ;;  %v944_v30 = vpop.f32.mrb[7].mxu1 }
 0x12b   : >> { %380 = vst.msk [vmem:[%s377_s11 + $0x10] sm:$0xff] %vm301_vm2, %v374_v29  ;;  %s1120_s11 = scalar_lea.vmem (%p275_p6), %s1119_s9, 1536 }
 0x12c   : > { %p1122_p1 = scmp.lt.s32.totalorder %s1120_s11, %s1114_s6 }
 0x12e   : > { %p1123_p3 = por %p1122_p1, %p1121_p10 }
 0x130   : > { %p1124_p5 = pnand %p1123_p3, %p1117_p4 }
 0x132   : > { %v382_v35 = vld [vmem:[#allocation2 + $0x18] sm:$0xff]  ;;  %v381_v37 = vld [vmem:[#allocation2] sm:$0xff]  ;;  %v383_v43 = vld [vmem:[#allocation2 + $0x30] sm:$0xff] }
 0x133   : > { %954 = vmatmul.mubr.msk.bf16.vlgmr.msra.gmra.mrb[0].mxu1 %vm301_vm2, %v382_v35  ;;  %950 = vmatmul.mubr.msk.bf16.vlgmr.msra.gmra.mrb[0].mxu0 %vm301_vm2, %v381_v37  ;;  %v565_v44 = vld [vmem:[#allocation2 + $0x10] sm:$0xff]  ;;  %v474_v45 = vld [vmem:[#allocation2 + $0x8] sm:$0xff]  ;;  %v475_v47 = vld [vmem:[#allocation2 + $0x20] sm:$0xff] }
 0x134   : > { %962 = vmatpush3.bf16.msra.mxu1 %v1080_v36  ;;  %957 = vmatprep.mubr.msk.bf16.mxu1 %vm1256_vm3, %v1255_v32  ;;  %v566_v46 = vld [vmem:[#allocation2 + $0x28] sm:$0xff]  ;;  %v567_v48 = vld [vmem:[#allocation2 + $0x40] sm:$0xff]  ;;  %v476_v49 = vld [vmem:[#allocation2 + $0x38] sm:$0xff] }
 0x135   : > { %963 = vmatprep.subr.bf16.mxu1 %v1255_v32  ;;  %978 = vmatpush3.bf16.msra.mxu0 %v1081_v39 }
 0x136   : > { %981 = vmatprep.mubr.msk.bf16.mxu0 %vm1256_vm3, %v1255_v32  ;;  %979 = vmatprep.subr.bf16.mxu0 %v1255_v32 }
 0x138   : > { %964 = vmatpush3.bf16.msra.mxu1 %v500_v41 }
 0x139   : > { %980 = vmatpush3.bf16.msra.mxu0 %v591_v42 }
 0x13b   : > { %958 = vmatmul.mubr.msk.bf16.gmra.mrb[4].mxu1 %vm301_vm2, %v383_v43 }
 0x13c   : > { %965 = vmatprep.mubr.msk.bf16.mxu1 %vm1256_vm3, %v1255_v32  ;;  %982 = vmatmul.mubr.msk.bf16.vlgmr.msra.gmra.mrb[4].mxu0 %vm301_vm2, %v565_v44 }
 0x13d   : > { %985 = vmatprep.mubr.msk.bf16.mxu0 %vm1256_vm3, %v1255_v32 }
 0x143   : > { %966 = vmatmul.mubr.msk.bf16.vlgmr.msra.gmra.mrb[8].mxu1 %vm301_vm2, %v474_v45 }
 0x144   : > { %969 = vmatprep.mubr.msk.bf16.mxu1 %vm1256_vm3, %v1255_v32  ;;  %986 = vmatmul.mubr.msk.bf16.gmra.mrb[8].mxu0 %vm301_vm2, %v566_v46 }
 0x145   : > { %989 = vmatprep.mubr.msk.bf16.mxu0 %vm1256_vm3, %v1255_v32 }
 0x14b   : > { %970 = vmatmul.mubr.msk.bf16.gmra.mrb[12].mxu1 %vm301_vm2, %v475_v47 }
 0x14c   : > { %973 = vmatprep.mubr.msk.bf16.mxu1 %vm1256_vm3, %v1255_v32  ;;  %990 = vmatmul.mubr.msk.bf16.gmra.mrb[12].mxu0 %vm301_vm2, %v567_v48 }
 0x153   : > { %974 = vmatmul.mubr.msk.bf16.gmra.mrb[16].mxu1 %vm301_vm2, %v476_v49 }
 0x206   : > { %v452_v50 = vpop.f32.mrb[0].mxu1  ;;  %v444_v52 = vpop.f32.mrb[0].mxu0 }
 0x207   : > { %470 = vst.msk [vmem:[%s1427_s12 + $0x10] sm:$0xff] %vm467_vm4, %v452_v50  ;;  %v955_v51 = vpop.f32.mrb[1].mxu1  ;;  %468 = vst.msk [vmem:[%s1427_s12] sm:$0xff] %vm467_vm4, %v444_v52  ;;  %v951_v54 = vpop.f32.mrb[1].mxu0 }
 0x208   : > { %v455_v53 = vpop.f32.mrb[2].mxu1  ;;  %v447_v56 = vpop.f32.mrb[2].mxu0 }
 0x209   : > { %471 = vst.msk [vmem:[%s1427_s12 + $0x18] sm:$0xff] %vm467_vm4, %v455_v53  ;;  %v956_v55 = vpop.f32.mrb[3].mxu1  ;;  %469 = vst.msk [vmem:[%s1427_s12 + $0x8] sm:$0xff] %vm467_vm4, %v447_v56  ;;  %v952_v57 = vpop.f32.mrb[3].mxu0 }
 0x20e   : > { %v460_v58 = vpop.f32.mrb[4].mxu1 }
 0x20f   : > { %472 = vst.msk [vmem:[%s1427_s12 + $0x20] sm:$0xff] %vm467_vm4, %v460_v58  ;;  %v959_v59 = vpop.f32.mrb[5].mxu1  ;;  %v627_v61 = vpop.f32.mrb[4].mxu0 }
 0x210   : > { %v463_v60 = vpop.f32.mrb[6].mxu1  ;;  %650 = vst.msk [vmem:[%s1431_s15] sm:$0xff] %vm467_vm4, %v627_v61  ;;  %v983_v63 = vpop.f32.mrb[5].mxu0 }
 0x211   : > { %473 = vst.msk [vmem:[%s1427_s12 + $0x28] sm:$0xff] %vm467_vm4, %v463_v60  ;;  %v960_v62 = vpop.f32.mrb[7].mxu1  ;;  %v630_v0 = vpop.f32.mrb[6].mxu0 }
 0x212   : > { %1127 = shalt.err (!%p1124_p5)
}
 0x213   : > { %s1128_s12 = scalar_lea.hbm %s1516_s26, 768  ;;  %s1132_s7 = scalar_lea.hbm %s1667_s3, 1536 }
 0x214   : > { %p1129_p7 = scmp.ne.s32.totalorder %s1516_s26, %s1128_s12  ;;  %p1133_p0 = scmp.lt.u32.totalorder %s1516_s26, %s1667_s3 }
 0x215   : > { %p1134_p2 = scmp.lt.u32.totalorder %s1132_s7, %s1128_s12  ;;  %p1136_p11 = scmp.lt.u32.totalorder %s1128_s12, %s1516_s26 }
 0x216   : > { %p1130_p8 = pnand %p1129_p7, %p1676_p12 }
 0x217   : > { %p1135_p6 = por %p1134_p2, %p1133_p0 }
 0x218   : > { %p1131_p9 = pneg %p1130_p8 }
 0x219   : > { %p1137_p13 = por %p1136_p11, %p1135_p6 }
 0x21b   : > { %p1138_p4 = pnand %p1137_p13, %p1131_p9 }
 0x21d   : > { %1141 = shalt.err (!%p1138_p4)
}
 0x21e   : > { %s1258_s6 = smov 128   ;;  %s1259_s11 = smov 8   ;;  %651 = vst.msk [vmem:[%s1431_s15 + $0x8] sm:$0xff] %vm467_vm4, %v630_v0  ;;  %v984_v1 = vpop.f32.mrb[7].mxu0  ;;  %v536_v2 = vpop.f32.mrb[8].mxu1 }
 0x21f   : > { %1007 = dma.vmem_to_hbm [thread:$0]  (%p1676_p12), %s1518_s28, 768, %s1516_s26, %s657_s8, %s1258_s6, %s1258_s6, %s1259_s11   ;;  %v967_v3 = vpop.f32.mrb[9].mxu1  ;;  %v635_v5 = vpop.f32.mrb[8].mxu0 }
 0x220   : > { %559 = vst.msk [vmem:[%s1429_s14] sm:$0xff] %vm467_vm4, %v536_v2  ;;  %v539_v4 = vpop.f32.mrb[10].mxu1  ;;  %652 = vst.msk [vmem:[%s1431_s15 + $0x10] sm:$0xff] %vm467_vm4, %v635_v5  ;;  %v987_v7 = vpop.f32.mrb[9].mxu0  ;;  %s661_s25 = sand.u32 1, %s1313_s22   ;;  %s698_s28 = sshll.u32 %s1429_s14, 4  ;;  %s1580_s28 = int_to_ptr.vmem [resolvable:$true] %s698_s28 }
 0x221   : > { %560 = vst.msk [vmem:[%s1429_s14 + $0x8] sm:$0xff] %vm467_vm4, %v539_v4  ;;  %v968_v6 = vpop.f32.mrb[11].mxu1  ;;  %v638_v8 = vpop.f32.mrb[10].mxu0  ;;  %s715_s26 = sshll.u32 %s1431_s15, 4  ;;  %s1578_s13 = scalar_lea.hbm %s1668_s4, %s1507_s16  ;;  %s1588_s26 = int_to_ptr.vmem [resolvable:$true] %s715_s26 }
 0x222   : > { %653 = vst.msk [vmem:[%s1431_s15 + $0x18] sm:$0xff] %vm467_vm4, %v638_v8  ;;  %v988_v9 = vpop.f32.mrb[11].mxu0  ;;  %v544_v10 = vpop.f32.mrb[12].mxu1  ;;  %s1586_s7 = scalar_lea.hbm %s1669_s5, %s1507_s16  ;;  %s1142_s10 = scalar_lea.vmem %s1580_s28, 768 }
 0x223   : > { %561 = vst.msk [vmem:[%s1429_s14 + $0x10] sm:$0xff] %vm467_vm4, %v544_v10  ;;  %v971_v11 = vpop.f32.mrb[13].mxu1  ;;  %v643_v13 = vpop.f32.mrb[12].mxu0  ;;  %p1143_p10 = scmp.ne.s32.totalorder %s1580_s28, %s1142_s10  ;;  %s1260_s9 = smov [#allocation7]  }
 0x224   : > { %v547_v12 = vpop.f32.mrb[14].mxu1  ;;  %654 = vst.msk [vmem:[%s1431_s15 + $0x20] sm:$0xff] %vm467_vm4, %v643_v13  ;;  %v991_v15 = vpop.f32.mrb[13].mxu0  ;;  %s1146_s8 = sshll.u32 %s1260_s9, 4  ;;  %s1147_s8 = int_to_ptr.vmem [resolvable:$false] %s1146_s8 }
 0x225   : > { %562 = vst.msk [vmem:[%s1429_s14 + $0x18] sm:$0xff] %vm467_vm4, %v547_v12  ;;  %v972_v14 = vpop.f32.mrb[15].mxu1  ;;  %v646_v16 = vpop.f32.mrb[14].mxu0  ;;  %p1144_p1 = pnand %p1143_p10, %p1676_p12  ;;  %s1148_s12 = scalar_lea.vmem %s1147_s8, 1536 }
 0x226   : > { %655 = vst.msk [vmem:[%s1431_s15 + $0x28] sm:$0xff] %vm467_vm4, %v646_v16  ;;  %v992_v17 = vpop.f32.mrb[15].mxu0  ;;  %v552_v18 = vpop.f32.mrb[16].mxu1  ;;  %s1592_s15 = scalar_lea.sflag [#allocation8], %s661_s25  ;;  %p1149_p5 = scmp.lt.s32.totalorder %s1580_s28, %s1147_s8 }
 0x227   : > { %563 = vst.msk [vmem:[%s1429_s14 + $0x20] sm:$0xff] %vm467_vm4, %v552_v18  ;;  %v975_v19 = vpop.f32.mrb[17].mxu1  ;;  %p1145_p3 = pneg %p1144_p1  ;;  %p1150_p7 = scmp.lt.s32.totalorder %s1148_s12, %s1142_s10 }
 0x228   : > { %v555_v20 = vpop.f32.mrb[18].mxu1 }
 0x229   : > { %564 = vst.msk [vmem:[%s1429_s14 + $0x28] sm:$0xff] %vm467_vm4, %v555_v20  ;;  %v976_v21 = vpop.f32.mrb[19].mxu1  ;;  %p1151_p8 = por %p1150_p7, %p1149_p5 }
 0x22b   : > { %p1152_p9 = pnand %p1151_p8, %p1145_p3 }
 0x22d   : > { %1155 = shalt.err (!%p1152_p9)
}
 0x22e   : > { %s1156_s14 = scalar_lea.hbm %s1578_s13, 768  ;;  %s1160_s17 = scalar_lea.hbm %s1668_s4, 1536 }
 0x22f   : > { %p1157_p0 = scmp.ne.s32.totalorder %s1578_s13, %s1156_s14  ;;  %p1161_p11 = scmp.lt.u32.totalorder %s1578_s13, %s1668_s4 }
 0x230   : > { %p1162_p13 = scmp.lt.u32.totalorder %s1160_s17, %s1156_s14  ;;  %p1164_p10 = scmp.lt.u32.totalorder %s1156_s14, %s1578_s13 }
 0x231   : > { %p1158_p2 = pnand %p1157_p0, %p1676_p12 }
 0x232   : > { %p1163_p4 = por %p1162_p13, %p1161_p11 }
 0x233   : > { %p1159_p6 = pneg %p1158_p2 }
 0x234   : > { %p1165_p1 = por %p1164_p10, %p1163_p4 }
 0x236   : > { %p1166_p3 = pnand %p1165_p1, %p1159_p6 }
 0x238   : > { %1169 = shalt.err (!%p1166_p3)
}
 0x239   : > { %1008 = dma.vmem_to_hbm [thread:$0]  (%p1676_p12), %s1580_s28, 768, %s1578_s13, %s1592_s15, %s1258_s6, %s1258_s6, %s1259_s11  }
 0x23a   : > { %s1170_s10 = scalar_lea.vmem %s1588_s26, 768  ;;  %s1261_s8 = smov [#allocation9]  }
 0x23b   : > { %p1171_p5 = scmp.ne.s32.totalorder %s1588_s26, %s1170_s10  ;;  %s1174_s12 = sshll.u32 %s1261_s8, 4  ;;  %s1175_s12 = int_to_ptr.vmem [resolvable:$false] %s1174_s12 }
 0x23c   : > { %s1176_s14 = scalar_lea.vmem %s1175_s12, 1536  ;;  %p1177_p9 = scmp.lt.s32.totalorder %s1588_s26, %s1175_s12 }
 0x23d   : > { %p1172_p7 = pnand %p1171_p5, %p1676_p12  ;;  %p1178_p0 = scmp.lt.s32.totalorder %s1176_s14, %s1170_s10 }
 0x23f   : > { %p1173_p8 = pneg %p1172_p7  ;;  %p1179_p2 = por %p1178_p0, %p1177_p9 }
 0x241   : > { %p1180_p6 = pnand %p1179_p2, %p1173_p8 }
 0x243   : > { %1183 = shalt.err (!%p1180_p6)
}
 0x244   : > { %s1184_s28 = scalar_lea.hbm %s1586_s7, 768  ;;  %s1188_s25 = scalar_lea.hbm %s1669_s5, 1536 }
 0x245   : > { %p1185_p11 = scmp.ne.s32.totalorder %s1586_s7, %s1184_s28  ;;  %p1189_p10 = scmp.lt.u32.totalorder %s1586_s7, %s1669_s5 }
 0x246   : > { %p1190_p1 = scmp.lt.u32.totalorder %s1188_s25, %s1184_s28  ;;  %p1192_p5 = scmp.lt.u32.totalorder %s1184_s28, %s1586_s7 }
 0x247   : > { %p1186_p13 = pnand %p1185_p11, %p1676_p12 }
 0x248   : > { %p1191_p3 = por %p1190_p1, %p1189_p10 }
 0x249   : > { %p1187_p4 = pneg %p1186_p13 }
 0x24a   : > { %p1193_p7 = por %p1192_p5, %p1191_p3 }
 0x24c   : > { %p1194_p8 = pnand %p1193_p7, %p1187_p4 }
 0x24e   : > { %1197 = shalt.err (!%p1194_p8)
}
 0x24f   : > { %1009 = dma.vmem_to_hbm [thread:$0]  (%p1676_p12), %s1588_s26, 768, %s1586_s7, %s1592_s15, %s1258_s6, %s1258_s6, %s1259_s11  }
 0x250 PF: > { %s730_s9 = sand.u32 1, %s1232_s18   ;;  %p1677_p9 = scmp.ne.s32.totalorder %s1673_s30, 0 }
 0x251   : > { %p1678_p0 = scmp.ge.s32.totalorder %s1244_s21, 2  ;;  %s731_s10 = scalar_lea.sflag [#allocation5], %s730_s9 }
 0x253   : > { %p1018_p2 = pnand %p1678_p0, %p1677_p9 }
 0x255   : > { %1223 = dma.done.wait (!%p1018_p2), %s731_s10, 768  }
 0x256   : > { %1225 = vsyncadd (!%p1018_p2), %s731_s10, 4294966528  ;;  %s739_s29 = sand.u32 1, %s858_s23  }
 0x257   : > { %s740_s8 = scalar_lea.sflag [#allocation8], %s739_s29 }
 0x258   : > { %1227 = dma.done.wait (!%p1018_p2), %s740_s8, 1536  }
 0x259   : > { %1229 = vsyncadd (!%p1018_p2), %s740_s8, 4294965760  ;;  %p22_p12 = scmp.ge.s32.totalorder %s1317_s24, 4   ;;  %s1679_s18 = smov %s1236_s19 }
 0x25a   : > { %s1680_s19 = smov %s1240_s20  ;;  %s1681_s20 = smov %s1329_s27 }
 0x25b   : > { %s1682_s21 = smov %s1317_s24  ;;  %24 = sbr.rel (!%p22_p12) target bundleno = 7 (0x7), region = 131 }
 0x262   :  { %754 = vsyncpa [#allocation4], 1 }
 0x263   :  { %756 = vsyncpa [#allocation4 + $0x1], 1 }
 0x264   :  { %757 = vsyncpa [#allocation5], 1 }
 0x265   :  { %759 = vsyncpa [#allocation5 + $0x1], 1 }
 0x266   :  { %760 = vsyncpa [#allocation8], 1 }
 0x267   :  { %762 = vsyncpa [#allocation8 + $0x1], 1 }

</bundles_post_ra>
